<compile_context>
chip_gen: v7x
topology: tpu7x:2x2x1
jax: 0.10.0
libtpu: 0.0.40
codegen_flags: <defaults>
</compile_context>

<pallas_src>
import jax
import jax.numpy as jnp
from jax.experimental import pallas as pl
from jax.experimental.pallas import tpu as pltpu


def _simplex_kernel(s_ref, ut_ref, o_ref):
    """s_ref: SMEM (B, 3); ut_ref: VMEM (1, 3, Mtile); o_ref: VMEM (1, 1, Mtile)."""
    b = pl.program_id(0)
    s0 = s_ref[b, 0]
    s1 = s_ref[b, 1]
    s2 = s_ref[b, 2]
    # Normalize the top-3 singular values once, on the scalar path.
    inv = 1.0 / (s0 + s1 + s2)
    w0 = s0 * inv
    w1 = s1 * inv
    w2 = s2 * inv

    u = ut_ref[0]                       # (3, Mtile), M on the lane axis
    # Weighted sum of the 3 principal directions == u3 @ s_norm  (lane-dense VPU FMAs).
    acc = u[0:1, :] * w0 + u[1:2, :] * w1 + u[2:3, :] * w2   # (1, Mtile)
    o_ref[0] = acc.astype(o_ref.dtype)


def _pick_mtile(M):
    # Largest lane-aligned tile (multiple of 128) that keeps VMEM use trivial,
    # including on v7x's 64 MiB VMEM; fall back to the full dim when M is not
    # a multiple of 128 (BlockSpec allows block dim == full array dim).
    if M % 128 == 0:
        return min(M, 2048)
    return M


def pca_simplex_pallas(u3, s3):
    """u3: (B, M, 3) top-3 left singular vectors; s3: (B, 3) top-3 singular values.

    Returns simplex of shape (B, M, 1).
    """
    B, M, K = u3.shape
    assert K == 3, "PCA simplex kernel expects the top-3 components"

    ut = jnp.transpose(u3, (0, 2, 1))     # (B, 3, M): put M on the lane axis
    mtile = _pick_mtile(M)
    grid = (B, pl.cdiv(M, mtile))

    out = pl.pallas_call(
        _simplex_kernel,
        out_shape=jax.ShapeDtypeStruct((B, 1, M), u3.dtype),
        grid=grid,
        in_specs=[
            # Singular values: whole (B, 3) array in SMEM, read as scalars.
            pl.BlockSpec(memory_space=pltpu.MemorySpace.SMEM),
            # Transposed U: one batch row, all 3 components, Mtile lanes.
            pl.BlockSpec((1, 3, mtile), lambda b, m: (b, 0, m)),
        ],
        # Lane-dense output blocks (unmasked full-width stores).
        out_specs=pl.BlockSpec((1, 1, mtile), lambda b, m: (b, 0, m)),
        compiler_params=pltpu.CompilerParams(
            dimension_semantics=("parallel", "parallel"),
        ),
    )(s3, ut)

    # (B, 1, M) -> (B, M, 1): pure layout plumbing in the wrapper.
    return out.reshape(B, M, 1)


def pca_forward(x):
    """Full PCA.forward equivalent. x: (B, M, N) float32 -> (B, M, 1)."""
    # TODO(synk): batched SVD is an iterative decomposition with no clean Pallas
    # TPU equivalent; it stays in plain JAX (reduced SVD to avoid the (B,M,M) U).
    u, s, _ = jnp.linalg.svd(x, full_matrices=False)   # u: (B, M, min(M,N)), s: (B, min(M,N))
    u3 = u[:, :, :3]                                   # (B, M, 3)
    s3 = s[:, :3]                                      # (B, 3)
    return pca_simplex_pallas(u3, s3)                  # (B, M, 1)


def _reference_forward(x):
    u, s, _ = jnp.linalg.svd(x, full_matrices=False)
    s3 = s[:, :3]
    s3 = s3 / jnp.sum(s3, axis=1, keepdims=True)
    u3 = u[:, :, :3]
    return jnp.matmul(u3, s3[..., None])


if __name__ == "__main__":
    key = jax.random.PRNGKey(0)
    B, M, N = 2, 16, 16
    x = jax.random.normal(key, (B, M, N), dtype=jnp.float32)

    out = pca_forward(x)
    out = jax.block_until_ready(out)

    ref = _reference_forward(x)
    assert out.shape == (B, M, 1), out.shape
    assert jnp.allclose(out, ref, atol=1e-5, rtol=1e-5), "mismatch vs reference"

    print("KERNEL_OK")
</pallas_src>

<mosaic_0001>
module attributes {stable_mosaic.version = 11 : i64} {
  func.func @_simplex_kernel(%arg0: i32, %arg1: i32, %arg2: memref<2x3xf32, #tpu.memory_space<smem>>, %arg3: memref<1x3x16xf32, #tpu.memory_space<vmem>>, %arg4: memref<1x1x16xf32, #tpu.memory_space<vmem>>) attributes {dimension_semantics = [#tpu.dimension_semantics<parallel>, #tpu.dimension_semantics<parallel>], iteration_bounds = array<i64: 2, 1>, scalar_prefetch = 0 : i64, scratch_operands = 0 : i64, tpu.core_type = #tpu.core_type<tc>, window_params = [{transform_indices = @transform_0, window_bounds = array<i64: 2, 3>}, {transform_indices = @transform_1, window_bounds = array<i64: 1, 3, 16>}, {transform_indices = @transform_2, window_bounds = array<i64: 1, 1, 16>}]} {
    %0 = arith.index_cast %arg0 : i32 to index
    %c0 = arith.constant 0 : index
    %1 = memref.load %arg2[%0, %c0] : memref<2x3xf32, #tpu.memory_space<smem>>
    %2 = arith.index_cast %arg0 : i32 to index
    %c1 = arith.constant 1 : index
    %3 = memref.load %arg2[%2, %c1] : memref<2x3xf32, #tpu.memory_space<smem>>
    %4 = arith.index_cast %arg0 : i32 to index
    %c2 = arith.constant 2 : index
    %5 = memref.load %arg2[%4, %c2] : memref<2x3xf32, #tpu.memory_space<smem>>
    %6 = arith.addf %1, %3 : f32
    %7 = arith.addf %6, %5 : f32
    %cst = arith.constant 1.000000e+00 : f32
    %8 = arith.divf %cst, %7 : f32
    %9 = arith.mulf %1, %8 : f32
    %10 = arith.mulf %3, %8 : f32
    %11 = arith.mulf %5, %8 : f32
    %c0_0 = arith.constant 0 : index
    %c0_1 = arith.constant 0 : index
    %c0_2 = arith.constant 0 : index
    %12 = vector.load %arg3[%c0_0, %c0_1, %c0_2] : memref<1x3x16xf32, #tpu.memory_space<vmem>>, vector<1x3x16xf32>
    %13 = vector.shape_cast %12 : vector<1x3x16xf32> to vector<3x16xf32>
    %14 = vector.extract_strided_slice %13 {offsets = [0, 0], sizes = [1, 16], strides = [1, 1]} : vector<3x16xf32> to vector<1x16xf32>
    %15 = vector.broadcast %9 : f32 to vector<1x16xf32>
    %16 = arith.mulf %14, %15 : vector<1x16xf32>
    %17 = vector.extract_strided_slice %13 {offsets = [1, 0], sizes = [1, 16], strides = [1, 1]} : vector<3x16xf32> to vector<1x16xf32>
    %18 = vector.broadcast %10 : f32 to vector<1x16xf32>
    %19 = arith.mulf %17, %18 : vector<1x16xf32>
    %20 = arith.addf %16, %19 : vector<1x16xf32>
    %21 = vector.extract_strided_slice %13 {offsets = [2, 0], sizes = [1, 16], strides = [1, 1]} : vector<3x16xf32> to vector<1x16xf32>
    %22 = vector.broadcast %11 : f32 to vector<1x16xf32>
    %23 = arith.mulf %21, %22 : vector<1x16xf32>
    %24 = arith.addf %20, %23 : vector<1x16xf32>
    %c0_3 = arith.constant 0 : index
    %c0_4 = arith.constant 0 : index
    %c0_5 = arith.constant 0 : index
    %25 = vector.load %arg4[%c0_3, %c0_4, %c0_5] : memref<1x1x16xf32, #tpu.memory_space<vmem>>, vector<1x1x16xf32>
    %26 = vector.shape_cast %25 : vector<1x1x16xf32> to vector<1x16xf32>
    %27 = vector.shape_cast %24 : vector<1x16xf32> to vector<1x1x16xf32>
    tpu.vector_store %arg4[%c0_3, %c0_4, %c0_5], %27 {strides = array<i32>} : memref<1x1x16xf32, #tpu.memory_space<vmem>>, vector<1x1x16xf32>,
    return
  }
  func.func @transform_0(%arg0: i32, %arg1: i32) -> (i32, i32) {
    %c0_i32 = arith.constant 0 : i32
    %c0_i32_0 = arith.constant 0 : i32
    %c0_i32_1 = arith.constant 0 : i32
    return %c0_i32, %c0_i32_0 : i32, i32
  }
  func.func @transform_1(%arg0: i32, %arg1: i32) -> (i32, i32, i32) {
    %c0_i32 = arith.constant 0 : i32
    %c0_i32_0 = arith.constant 0 : i32
    return %arg0, %c0_i32, %arg1 : i32, i32, i32
  }
  func.func @transform_2(%arg0: i32, %arg1: i32) -> (i32, i32, i32) {
    %c0_i32 = arith.constant 0 : i32
    %c0_i32_0 = arith.constant 0 : i32
    return %arg0, %c0_i32, %arg1 : i32, i32, i32
  }
}

</mosaic_0001>

<bundles_post_ra>
// kernel: tpu_custom_call.1
= control target key start
LH: loop header
LB: loop body
LE: loop exit
PB: predicated region body
PF: predicated region fallthrough
CT: control target
= control target key end

     0   :  { %7 = vsyncpa [#allocation4], 0  ;;  %s633_s0 = inlined_call_operand.vmem [shape: f32[2,3], index: 0, kind: input, shape index: {}]   ;;  %s634_s1 = inlined_call_operand.vmem [shape: f32[2,3,16], index: 1, kind: input, shape index: {}]   ;;  %s635_s2 = inlined_call_operand.hbm [shape: f32[2,1,16], index: 2, kind: output, shape index: {}]  }
   0x1   :  { %8 = vsyncpa [#allocation3], 0 }
   0x2   :  { %10 = vsyncpa [#allocation3 + $0x1], 0  ;;  %s499_s9 = smov 0   ;;  %s501_s10 = smov 0  }
   0x3   :  { %s503_s11 = smov 0   ;;  %s505_s12 = smov 0  }
   0x4   :  { %s507_s13 = smov 0   ;;  %s509_s14 = smov 0  }
   0x5 LB: > { %s301_s15 = sadd.s32 4294967295, %s480_s14   ;;  %s302_s16 = sadd.s32 4294967294, %s480_s14   ;;  %s480_s14 = sphi %s509_s14, %s16_s14   ;;  %s476_s13 = sphi %s507_s13, %s644_s13   ;;  %s472_s12 = sphi %s505_s12, %s643_s12   ;;  %s468_s11 = sphi %s503_s11, %s642_s11   ;;  %s464_s10 = sphi %s501_s10, %s641_s10   ;;  %s460_s9 = sphi %s499_s9, %s640_s9  }
   0x6   : > { %s28_s17 = sadd.s32 1, %s476_s13  ;;  %s86_s18 = sadd.s32 1, %s468_s11 }
   0x7   : > { %p30_p0 = scmp.ge.s32.totalorder %s28_s17, 2  ;;  %p96_p1 = scmp.ne.s32.totalorder %s468_s11, %s464_s10 }
   0x8   : > { %p97_p2 = scmp.eq.s32.totalorder %s301_s15, 1  ;;  %p102_p3 = scmp.ne.s32.totalorder %s464_s10, %s460_s9 }
   0x9   : > { %s646_s17 = smov (%p30_p0, %s28_s17), 0  ;;  %p103_p5 = scmp.eq.s32.totalorder %s302_s16, 1 }
   0xa   : > { %p539_p4 = por %p97_p2, %p96_p1  ;;  %s81_s20 = ssub.s32 %s476_s13, %s646_s17 }
   0xb   : > { %p303_p6 = scmp.ge.s32.totalorder %s480_s14, 1  ;;  %p84_p7 = scmp.eq.s32.totalorder %s81_s20, 0 }
   0xc   : > { %p546_p8 = por %p103_p5, %p102_p3  ;;  %p110_p9 = scmp.lt.s32.totalorder %s480_s14, 3 }
   0xd   : > { %s552_s22 = scalar_select %p84_p7, %s468_s11, %s86_s18  }
   0xe   : > { %p554_p10 = pnand %p303_p6, %p110_p9  ;;  %p558_p11 = scmp.eq.s32.totalorder %s301_s15, 0 }
   0xf   : > { %s123_s27 = sshll.u32 %s633_s0, 4  ;;  %s124_s27 = int_to_ptr.vmem [resolvable:$true] %s123_s27 }
  0x10   : > { %p321_p12 = pneg %p554_p10  ;;  %s383_s28 = scalar_lea.vmem %s124_s27, 32 }
  0x11   : > { %p384_p0 = scmp.ne.s32.totalorder %s124_s27, %s383_s28  ;;  %p391_p5 = scmp.lt.s32.totalorder %s124_s27, %s124_s27 }
  0x12   : > { %p322_p13 = pnand %p558_p11, %p321_p12  ;;  %p392_p6 = scmp.lt.s32.totalorder %s383_s28, %s383_s28 }
  0x14   : > { %p385_p1 = pneg %p322_p13  ;;  %p393_p7 = por %p392_p6, %p391_p5 }
  0x16   : > { %p386_p2 = pnand %p385_p1, %p384_p0 }
  0x18   : > { %p387_p3 = pneg %p386_p2 }
  0x1a   : > { %p394_p9 = pnand %p393_p7, %p387_p3 }
  0x1c   : > { %397 = shalt.err (!%p394_p9)
}
  0x1d   : > { %s482_s29 = smov [#allocation2]   ;;  %146 = sbr.rel (%p554_p10) target bundleno = 139 (0x8b), region = 28 }
  0x1e   : > { %324 = dma.vmem_to_smem (!%p322_p13), %s124_s27, 32, %s482_s29, [#allocation4]  }
  0x24   : > { %451 = dma.done.wait (%p558_p11), [#allocation4], 32  }
  0x25   : > { %453 = vsyncadd (%p558_p11), [#allocation4], 4294967264 }
  0x26   : > { %152 = sfence }
  0x27   : > { %s309_s30 = sshll.u32 %s472_s12, 7  ;;  %p170_p10 = scmp.lt.s32.totalorder %s472_s12, 1  ;;  %vm206_vm0 = vcmask 122880  }
  0x28   : > { %s178_s3 = sld [smem:[#allocation2 + %s309_s30]]  ;;  %s179_s4 = sadd.s32 1, %s309_s30 }
  0x29   : > { %s180_s5 = sld [smem:[#allocation2 + %s179_s4]]  ;;  %s181_s6 = sadd.s32 2, %s309_s30 }
  0x2a   : > { %s182_s7 = sld [smem:[#allocation2 + %s181_s6]]  ;;  %s168_s28 = sand.u32 1, %s464_s10  }
  0x2b   : > { %s171_s16 = scalar_select %p170_p10, %s472_s12, 1 }
  0x2c   : > { %s310_s30 = sshll.u32 %s472_s12, 4  ;;  %s169_s4 = scalar_lea.vmem [#allocation5], %s168_s28 }
  0x2d   : > { %s308_s18 = sshll.u32 %s171_s16, 2  ;;  %s222_s6 = sshll.u32 %s169_s4, 4  ;;  %s588_s6 = int_to_ptr.vmem [resolvable:$true] %s222_s6 }
  0x2e   : > { %s176_s24 = scalar_lea.vmem %s634_s1, %s308_s18  ;;  %s483_s12 = smov [#allocation5]  }
  0x2f   : > { %s183_s8 = sadd.f32 %s180_s5, %s178_s3  ;;  %v191_v2 = vld [vmem:[%s176_s24] sm:$0x7]  ;;  %s402_s16 = sshll.u32 %s483_s12, 4  ;;  %s403_s16 = int_to_ptr.vmem [resolvable:$false] %s402_s16 }
  0x30   : > { %s404_s18 = scalar_lea.vmem %s403_s16, 32  ;;  %p405_p0 = scmp.lt.s32.totalorder %s588_s6, %s403_s16 }
  0x31   : > { %s184_s15 = sadd.f32 %s183_s8, %s182_s7  ;;  %s586_s8 = scalar_lea.hbm %s635_s2, %s310_s30 }
  0x33   : > { %v185_v0 = vstv %s184_s15  ;;  %s398_s15 = scalar_lea.vmem %s588_s6, 16 }
  0x34   : > { %381 = vrcp.f32 %v185_v0  ;;  %p399_p11 = scmp.ne.s32.totalorder %s588_s6, %s398_s15  ;;  %p406_p1 = scmp.lt.s32.totalorder %s404_s18, %s398_s15 }
  0x36   : > { %p400_p12 = pnand %p399_p11, %p539_p4  ;;  %p407_p2 = por %p406_p1, %p405_p0 }
  0x38   : > { %p401_p13 = pneg %p400_p12 }
  0x3a   : > { %p408_p3 = pnand %p407_p2, %p401_p13 }
  0x3e   : > { %v382_v1 = vpop.eup %381 }
  0x3f   : > { %313 = vpush %v382_v1 }
  0x70   : > { %s314_s25 = spop %313 }
  0x71   : > { %s188_s26 = smul.f32 %s314_s25, %s178_s3 }
  0x72   : > { %s189_s27 = smul.f32 %s314_s25, %s180_s5 }
  0x73   : > { %s190_s29 = smul.f32 %s314_s25, %s182_s7  ;;  %v192_v3 = vstv %s188_s26  ;;  %s209_s7 = scalar_lea.sflag [#allocation3], %s168_s28 }
  0x74   : > { %v194_v4 = vstv %s189_s27  ;;  %v193_v8 = vmul.f32 %v192_v3, %v191_v2 }
  0x75   : > { %v195_v5 = vmul.f32 %v194_v4, %v191_v2  ;;  %v200_v6 = vstv %s190_s29 }
  0x76   : > { %v201_v7 = vmul.f32 %v200_v6, %v191_v2 }
  0x77   : > { %v197_v9 = vrot.slane %v195_v5, 1 }
  0x78   : > { %v203_v11 = vrot.slane %v201_v7, 2 }
  0x79   : > { %v199_v10 = vadd.f32 %v197_v9, %v193_v8 }
  0x7b   : > { %v205_v12 = vadd.f32 %v203_v11, %v199_v10 }
  0x7d   : > { %207 = vst.msk [vmem:[%s169_s4] sm:$0x1] %vm206_vm0, %v205_v12 }
  0x7e   : > { %411 = shalt.err (!%p408_p3)
}
  0x7f   : > { %s412_s20 = scalar_lea.hbm %s586_s8, 16  ;;  %s416_s25 = scalar_lea.hbm %s635_s2, 32 }
  0x80   : > { %p413_p5 = scmp.ne.s32.totalorder %s586_s8, %s412_s20  ;;  %p417_p9 = scmp.lt.u32.totalorder %s586_s8, %s635_s2 }
  0x81   : > { %p418_p10 = scmp.lt.u32.totalorder %s416_s25, %s412_s20  ;;  %p420_p12 = scmp.lt.u32.totalorder %s412_s20, %s586_s8 }
  0x82   : > { %p414_p6 = pnand %p413_p5, %p539_p4 }
  0x83   : > { %p419_p11 = por %p418_p10, %p417_p9 }
  0x84   : > { %p415_p7 = pneg %p414_p6 }
  0x85   : > { %p421_p13 = por %p420_p12, %p419_p11 }
  0x87   : > { %p422_p0 = pnand %p421_p13, %p415_p7 }
  0x89   : > { %425 = shalt.err (!%p422_p0)
}
  0x8a   : > { %319 = dma.vmem_to_hbm [thread:$0]  (%p539_p4), %s588_s6, 16, %s586_s8, %s209_s7  }
  0x8b PF: > { %p331_p1 = scmp.ge.s32.totalorder %s480_s14, 2  ;;  %s234_s28 = sand.u32 1, %s460_s9  }
  0x8c   : > { %s235_s29 = scalar_lea.sflag [#allocation3], %s234_s28 }
  0x8d   : > { %p326_p2 = pnand %p331_p1, %p546_p8 }
  0x8f   : > { %455 = dma.done.wait (!%p326_p2), %s235_s29, 16  }
  0x90   : > { %457 = vsyncadd (!%p326_p2), %s235_s29, 4294967280  ;;  %s16_s14 = sadd.s32 1, %s480_s14   ;;  %s640_s9 = smov %s464_s10 }
  0x91   : > { %p13_p3 = scmp.ge.s32.totalorder %s16_s14, 4   ;;  %s641_s10 = smov %s468_s11 }
  0x92   : > { %s642_s11 = smov %s552_s22  ;;  %s643_s12 = smov %s476_s13 }
  0x93   : > { %s644_s13 = smov %s646_s17  ;;  %15 = sbr.rel (!%p13_p3) target bundleno = 5 (0x5), region = 68 }
  0x9a   :  { %239 = vsyncpa [#allocation3], 1 }
  0x9b   :  { %241 = vsyncpa [#allocation3 + $0x1], 1 }
  0x9c   :  { %242 = vsyncpa [#allocation4], 1 }
  0x9d   :  { %244 = vsyncpa [#allocation4 + $0x1], 1 }

</bundles_post_ra>
